<compile_context>
chip_gen: v6e
topology: v6e:2x2x1
jax: 0.10.0
libtpu: 0.0.40
codegen_flags: <defaults>
</compile_context>

<pallas_src>
import functools

import jax
import jax.numpy as jnp
from jax.experimental import pallas as pl
from jax.experimental.pallas import tpu as pltpu


def _loss_sums_kernel(x_ref, t_ref, out_ref, *, lane_tile, hw, needs_mask):
    """Accumulate per-row (= per (batch, channel)) partial sums over one
    spatial chunk.  out_ref columns: [sum(p*t), sum(p), sum(t), sum(BCE)]."""
    k = pl.program_id(1)

    @pl.when(k == 0)
    def _():
        out_ref[...] = jnp.zeros_like(out_ref)

    x = x_ref[...].astype(jnp.float32)
    t = t_ref[...].astype(jnp.float32)

    if needs_mask:
        lane = jax.lax.broadcasted_iota(jnp.int32, x.shape, 1)
        valid = (k * lane_tile + lane) < hw
        x = jnp.where(valid, x, 0.0)
        t = jnp.where(valid, t, 0.0)

    # BCE from logits (numerically stable), sharing exp(-|x|)/log1p between the
    # sigmoid and both log terms; each log term clamped at -100 as in
    # F.binary_cross_entropy.
    # NOTE: in the f32-saturation regime (|x| >~ 17..100) the sigmoid-then-log
    # path of the original module clamps earlier (to -100); the logits form
    # returns the mathematically exact value there.  Identical otherwise.
    e = jnp.exp(-jnp.abs(x))          # exp(-|x|)
    lg = jnp.log1p(e)                 # log(1 + exp(-|x|))
    log_p = jnp.maximum(-(jnp.maximum(-x, 0.0) + lg), -100.0)   # log(sigmoid(x))
    log_1mp = jnp.maximum(-(jnp.maximum(x, 0.0) + lg), -100.0)  # log(1 - sigmoid(x))
    bce = -(t * log_p + (1.0 - t) * log_1mp)

    inv = pl.reciprocal(1.0 + e, approx=False)
    p = jnp.where(x >= 0.0, inv, e * inv)   # sigmoid(x), reusing exp(-|x|)

    if needs_mask:
        p = jnp.where(valid, p, 0.0)
        bce = jnp.where(valid, bce, 0.0)

    out_ref[:, 0:1] += jnp.sum(p * t, axis=-1, keepdims=True)
    out_ref[:, 1:2] += jnp.sum(p, axis=-1, keepdims=True)
    out_ref[:, 2:3] += jnp.sum(t, axis=-1, keepdims=True)
    out_ref[:, 3:4] += jnp.sum(bce, axis=-1, keepdims=True)


_LANE_TILE_CAP = 16 * 1024               # lanes per spatial chunk (mult. of 128)
_BLOCK_BYTES_TARGET = 4 * 1024 * 1024    # combined x+t bytes per block (~fits
                                         # v5e's 16 MiB scoped VMEM when 2x
                                         # double-buffered)


def _choose_tiles(bc, hw, x_bytes, t_bytes, lane_tile_cap, block_bytes_target):
    if hw <= lane_tile_cap:
        lane_tile = hw                           # full extent: always legal
    else:
        lane_tile = lane_tile_cap                # multiple of 128; tail masked
    rows = block_bytes_target // max(1, lane_tile * (x_bytes + t_bytes))
    rows = max(8, (rows // 8) * 8)
    rows = min(rows, 1024)
    if bc < 8:
        row_tile = bc                            # block == full dim: legal
    else:
        row_tile = min(rows, (bc // 8) * 8)      # multiple of 8, <= bc
    return row_tile, lane_tile


def channel_weighted_dice_bce_loss(inputs, targets, weights, smooth=1.0,
                                   lane_tile_cap=_LANE_TILE_CAP,
                                   block_bytes_target=_BLOCK_BYTES_TARGET):
    """inputs: (B, C, H, W) logits (any float dtype, fed to the kernel as-is);
    targets: (B, C, H, W) values in [0, 1]; weights: (C,) per-channel weights."""
    B, C, H, W = inputs.shape
    BC, HW = B * C, H * W

    # Native dtypes straight to the kernel: no f32 upcast, no HBM pad copies.
    x = inputs.reshape(BC, HW)
    t = targets.reshape(BC, HW)

    x_bytes = jnp.dtype(x.dtype).itemsize
    t_bytes = jnp.dtype(t.dtype).itemsize
    row_tile, lane_tile = _choose_tiles(BC, HW, x_bytes, t_bytes,
                                        lane_tile_cap, block_bytes_target)
    needs_mask = (HW % lane_tile) != 0

    grid = (pl.cdiv(BC, row_tile), pl.cdiv(HW, lane_tile))
    in_spec = pl.BlockSpec((row_tile, lane_tile), lambda i, k: (i, k))
    out_spec = pl.BlockSpec((row_tile, 4), lambda i, k: (i, 0))

    kernel = functools.partial(_loss_sums_kernel, lane_tile=lane_tile,
                               hw=HW, needs_mask=needs_mask)

    sums = pl.pallas_call(
        kernel,
        grid=grid,
        in_specs=[in_spec, in_spec],
        out_specs=out_spec,
        out_shape=jax.ShapeDtypeStruct((BC, 4), jnp.float32),
        compiler_params=pltpu.CompilerParams(
            dimension_semantics=("parallel", "arbitrary")),
        cost_estimate=pl.CostEstimate(
            flops=12 * BC * HW,
            transcendentals=2 * BC * HW,
            bytes_accessed=BC * HW * (x_bytes + t_bytes) + BC * 4 * 4),
    )(x, t)

    inter = sums[:, 0].reshape(B, C)
    psum = sums[:, 1].reshape(B, C)
    tsum = sums[:, 2].reshape(B, C)
    bce_pc = (sums[:, 3] / float(HW)).reshape(B, C)

    # w = weights.unsqueeze(0).repeat(B, 1); tiny (B, C) math stays in JAX glue.
    w = jnp.broadcast_to(weights.astype(jnp.float32)[None, :], (B, C))

    dice = 1.0 - (2.0 * inter + smooth) / (psum + tsum + smooth)
    dice_loss = jnp.mean(dice * w)
    bce_loss = jnp.mean(bce_pc * w)
    return bce_loss + dice_loss


def _reference_loss(inputs, targets, weights, smooth=1.0):
    """Pure-JAX port of the PyTorch forward (sigmoid-then-BCE, -100 clamp)."""
    B, C = inputs.shape[0], inputs.shape[1]
    w = jnp.broadcast_to(weights.astype(jnp.float32)[None, :], (B, C))
    p = jax.nn.sigmoid(inputs.astype(jnp.float32))
    t = targets.astype(jnp.float32)
    inter = jnp.sum(p * t, axis=(-2, -1))
    dice = 1.0 - (2.0 * inter + smooth) / (
        jnp.sum(p, axis=(-2, -1)) + jnp.sum(t, axis=(-2, -1)) + smooth)
    dice_loss = jnp.mean(dice * w)
    log_p = jnp.maximum(jnp.log(p), -100.0)
    log_1mp = jnp.maximum(jnp.log1p(-p), -100.0)
    bce = -(t * log_p + (1.0 - t) * log_1mp)
    bce_pc = jnp.mean(bce, axis=(-2, -1))
    bce_loss = jnp.mean(bce_pc * w)
    return bce_loss + dice_loss


if __name__ == "__main__":
    key = jax.random.PRNGKey(0)

    # --- Test 1: small shape, single block (module default: 4 channels). ---
    B, C, H, W = 2, 4, 16, 16
    k_in, k_tg, key = jax.random.split(key, 3)
    inputs = jax.random.normal(k_in, (B, C, H, W), dtype=jnp.float32)
    targets = (jax.random.uniform(k_tg, (B, C, H, W)) > 0.5).astype(jnp.float32)
    weights = jnp.ones((C,), dtype=jnp.float32)  # torch.tensor([1, 1, 1, 1])

    loss = channel_weighted_dice_bce_loss(inputs, targets, weights, smooth=1.0)
    loss = jax.block_until_ready(loss)
    ref = _reference_loss(inputs, targets, weights, smooth=1.0)
    assert jnp.allclose(loss, ref, rtol=1e-5, atol=1e-5), (loss, ref)

    # --- Test 2: exercises the HW-chunked accumulation path (forced small
    # lane tile -> lane masking on the tail chunk) and a partial row block. ---
    B2, C2, H2, W2 = 3, 3, 16, 20
    k_in2, k_tg2, key = jax.random.split(key, 3)
    inputs2 = jax.random.normal(k_in2, (B2, C2, H2, W2), dtype=jnp.float32)
    targets2 = (jax.random.uniform(k_tg2, (B2, C2, H2, W2)) > 0.5).astype(jnp.float32)
    weights2 = jnp.ones((C2,), dtype=jnp.float32)

    loss2 = channel_weighted_dice_bce_loss(inputs2, targets2, weights2,
                                           smooth=1.0, lane_tile_cap=128)
    loss2 = jax.block_until_ready(loss2)
    ref2 = _reference_loss(inputs2, targets2, weights2, smooth=1.0)
    assert jnp.allclose(loss2, ref2, rtol=1e-5, atol=1e-5), (loss2, ref2)

    print("KERNEL_OK")
</pallas_src>

<mosaic_0001>
module attributes {stable_mosaic.version = 11 : i64} {
  func.func @_loss_sums_kernel(%arg0: i32, %arg1: i32, %arg2: memref<8x256xf32, #tpu.memory_space<vmem>>, %arg3: memref<8x256xf32, #tpu.memory_space<vmem>>, %arg4: memref<8x4xf32, #tpu.memory_space<vmem>>) attributes {dimension_semantics = [#tpu.dimension_semantics<parallel>, #tpu.dimension_semantics<arbitrary>], iteration_bounds = array<i64: 1, 1>, scalar_prefetch = 0 : i64, scratch_operands = 0 : i64, tpu.core_type = #tpu.core_type<tc>, window_params = [{transform_indices = @transform_0, window_bounds = array<i64: 8, 256>}, {transform_indices = @transform_1, window_bounds = array<i64: 8, 256>}, {transform_indices = @transform_2, window_bounds = array<i64: 8, 4>}]} {
    %c0_i32 = arith.constant 0 : i32
    %0 = arith.cmpi eq, %arg1, %c0_i32 : i32
    %1 = arith.extui %0 : i1 to i32
    %c0_i32_0 = arith.constant 0 : i32
    %2 = arith.cmpi ne, %1, %c0_i32_0 : i32
    scf.if %2 {
      %cst_32 = arith.constant 0.000000e+00 : f32
      %61 = vector.broadcast %cst_32 : f32 to vector<8x4xf32>
      %c0_33 = arith.constant 0 : index
      %c0_34 = arith.constant 0 : index
      %62 = vector.load %arg4[%c0_33, %c0_34] : memref<8x4xf32, #tpu.memory_space<vmem>>, vector<8x4xf32>
      tpu.vector_store %arg4[%c0_33, %c0_34], %61 {strides = array<i32>} : memref<8x4xf32, #tpu.memory_space<vmem>>, vector<8x4xf32>,
    } else {
    }
    %c0 = arith.constant 0 : index
    %c0_1 = arith.constant 0 : index
    %3 = vector.load %arg2[%c0, %c0_1] : memref<8x256xf32, #tpu.memory_space<vmem>>, vector<8x256xf32>
    %c0_2 = arith.constant 0 : index
    %c0_3 = arith.constant 0 : index
    %4 = vector.load %arg3[%c0_2, %c0_3] : memref<8x256xf32, #tpu.memory_space<vmem>>, vector<8x256xf32>
    %5 = math.absf %3 : vector<8x256xf32>
    %cst = arith.constant 0.000000e+00 : f32
    %6 = vector.broadcast %cst : f32 to vector<8x256xf32>
    %7 = arith.subf %6, %5 : vector<8x256xf32>
    %8 = math.exp %7 : vector<8x256xf32>
    %9 = math.log1p %8 : vector<8x256xf32>
    %cst_4 = arith.constant 0.000000e+00 : f32
    %10 = vector.broadcast %cst_4 : f32 to vector<8x256xf32>
    %11 = arith.subf %10, %3 : vector<8x256xf32>
    %cst_5 = arith.constant 0.000000e+00 : f32
    %12 = vector.broadcast %cst_5 : f32 to vector<8x256xf32>
    %13 = arith.maximumf %11, %12 : vector<8x256xf32>
    %14 = arith.addf %13, %9 : vector<8x256xf32>
    %cst_6 = arith.constant 0.000000e+00 : f32
    %15 = vector.broadcast %cst_6 : f32 to vector<8x256xf32>
    %16 = arith.subf %15, %14 : vector<8x256xf32>
    %cst_7 = arith.constant -1.000000e+02 : f32
    %17 = vector.broadcast %cst_7 : f32 to vector<8x256xf32>
    %18 = arith.maximumf %16, %17 : vector<8x256xf32>
    %cst_8 = arith.constant 0.000000e+00 : f32
    %19 = vector.broadcast %cst_8 : f32 to vector<8x256xf32>
    %20 = arith.maximumf %3, %19 : vector<8x256xf32>
    %21 = arith.addf %20, %9 : vector<8x256xf32>
    %cst_9 = arith.constant 0.000000e+00 : f32
    %22 = vector.broadcast %cst_9 : f32 to vector<8x256xf32>
    %23 = arith.subf %22, %21 : vector<8x256xf32>
    %cst_10 = arith.constant -1.000000e+02 : f32
    %24 = vector.broadcast %cst_10 : f32 to vector<8x256xf32>
    %25 = arith.maximumf %23, %24 : vector<8x256xf32>
    %26 = arith.mulf %4, %18 : vector<8x256xf32>
    %cst_11 = arith.constant 1.000000e+00 : f32
    %27 = vector.broadcast %cst_11 : f32 to vector<8x256xf32>
    %28 = arith.subf %27, %4 : vector<8x256xf32>
    %29 = arith.mulf %28, %25 : vector<8x256xf32>
    %30 = arith.addf %26, %29 : vector<8x256xf32>
    %cst_12 = arith.constant 0.000000e+00 : f32
    %31 = vector.broadcast %cst_12 : f32 to vector<8x256xf32>
    %32 = arith.subf %31, %30 : vector<8x256xf32>
    %cst_13 = arith.constant 1.000000e+00 : f32
    %33 = vector.broadcast %cst_13 : f32 to vector<8x256xf32>
    %34 = arith.addf %33, %8 : vector<8x256xf32>
    %35 = tpu.reciprocal %34 : vector<8x256xf32> -> vector<8x256xf32>
    %cst_14 = arith.constant 0.000000e+00 : f32
    %36 = vector.broadcast %cst_14 : f32 to vector<8x256xf32>
    %37 = arith.cmpf oge, %3, %36 : vector<8x256xf32>
    %38 = arith.mulf %8, %35 : vector<8x256xf32>
    %39 = arith.select %37, %35, %38 : vector<8x256xi1>, vector<8x256xf32>
    %c0_15 = arith.constant 0 : index
    %c0_16 = arith.constant 0 : index
    %40 = vector.load %arg4[%c0_15, %c0_16] : memref<8x4xf32, #tpu.memory_space<vmem>>, vector<8x1xf32>
    %41 = arith.mulf %39, %4 : vector<8x256xf32>
    %cst_17 = arith.constant dense<0.000000e+00> : vector<8xf32>
    %42 = vector.multi_reduction <add>, %41, %cst_17 [1] : vector<8x256xf32> to vector<8xf32>
    %43 = vector.shape_cast %42 : vector<8xf32> to vector<8x1xf32>
    %44 = arith.addf %40, %43 : vector<8x1xf32>
    %c0_18 = arith.constant 0 : index
    %c0_19 = arith.constant 0 : index
    %45 = vector.load %arg4[%c0_18, %c0_19] : memref<8x4xf32, #tpu.memory_space<vmem>>, vector<8x1xf32>
    tpu.vector_store %arg4[%c0_18, %c0_19], %44 {strides = array<i32>} : memref<8x4xf32, #tpu.memory_space<vmem>>, vector<8x1xf32>,
    %c0_20 = arith.constant 0 : index
    %c1 = arith.constant 1 : index
    %46 = vector.load %arg4[%c0_20, %c1] : memref<8x4xf32, #tpu.memory_space<vmem>>, vector<8x1xf32>
    %cst_21 = arith.constant dense<0.000000e+00> : vector<8xf32>
    %47 = vector.multi_reduction <add>, %39, %cst_21 [1] : vector<8x256xf32> to vector<8xf32>
    %48 = vector.shape_cast %47 : vector<8xf32> to vector<8x1xf32>
    %49 = arith.addf %46, %48 : vector<8x1xf32>
    %c0_22 = arith.constant 0 : index
    %c1_23 = arith.constant 1 : index
    %50 = vector.load %arg4[%c0_22, %c1_23] : memref<8x4xf32, #tpu.memory_space<vmem>>, vector<8x1xf32>
    tpu.vector_store %arg4[%c0_22, %c1_23], %49 {strides = array<i32>} : memref<8x4xf32, #tpu.memory_space<vmem>>, vector<8x1xf32>,
    %c0_24 = arith.constant 0 : index
    %c2 = arith.constant 2 : index
    %51 = vector.load %arg4[%c0_24, %c2] : memref<8x4xf32, #tpu.memory_space<vmem>>, vector<8x1xf32>
    %cst_25 = arith.constant dense<0.000000e+00> : vector<8xf32>
    %52 = vector.multi_reduction <add>, %4, %cst_25 [1] : vector<8x256xf32> to vector<8xf32>
    %53 = vector.shape_cast %52 : vector<8xf32> to vector<8x1xf32>
    %54 = arith.addf %51, %53 : vector<8x1xf32>
    %c0_26 = arith.constant 0 : index
    %c2_27 = arith.constant 2 : index
    %55 = vector.load %arg4[%c0_26, %c2_27] : memref<8x4xf32, #tpu.memory_space<vmem>>, vector<8x1xf32>
    tpu.vector_store %arg4[%c0_26, %c2_27], %54 {strides = array<i32>} : memref<8x4xf32, #tpu.memory_space<vmem>>, vector<8x1xf32>,
    %c0_28 = arith.constant 0 : index
    %c3 = arith.constant 3 : index
    %56 = vector.load %arg4[%c0_28, %c3] : memref<8x4xf32, #tpu.memory_space<vmem>>, vector<8x1xf32>
    %cst_29 = arith.constant dense<0.000000e+00> : vector<8xf32>
    %57 = vector.multi_reduction <add>, %32, %cst_29 [1] : vector<8x256xf32> to vector<8xf32>
    %58 = vector.shape_cast %57 : vector<8xf32> to vector<8x1xf32>
    %59 = arith.addf %56, %58 : vector<8x1xf32>
    %c0_30 = arith.constant 0 : index
    %c3_31 = arith.constant 3 : index
    %60 = vector.load %arg4[%c0_30, %c3_31] : memref<8x4xf32, #tpu.memory_space<vmem>>, vector<8x1xf32>
    tpu.vector_store %arg4[%c0_30, %c3_31], %59 {strides = array<i32>} : memref<8x4xf32, #tpu.memory_space<vmem>>, vector<8x1xf32>,
    return
  }
  func.func @transform_0(%arg0: i32, %arg1: i32) -> (i32, i32) {
    %c0_i32 = arith.constant 0 : i32
    return %arg0, %arg1 : i32, i32
  }
  func.func @transform_1(%arg0: i32, %arg1: i32) -> (i32, i32) {
    %c0_i32 = arith.constant 0 : i32
    return %arg0, %arg1 : i32, i32
  }
  func.func @transform_2(%arg0: i32, %arg1: i32) -> (i32, i32) {
    %c0_i32 = arith.constant 0 : i32
    %c0_i32_0 = arith.constant 0 : i32
    return %arg0, %c0_i32 : i32, i32
  }
}

</mosaic_0001>

<bundles_post_ra>
// kernel: tpu_custom_call.1
= control target key start
LH: loop header
LB: loop body
LE: loop exit
PB: predicated region body
PF: predicated region fallthrough
CT: control target
= control target key end

     0   :  { %7 = vsyncpa [#allocation3], 0  ;;  %s268_s0 = inlined_call_operand.hbm [shape: f32[8,256], index: 0, kind: input, shape index: {}]   ;;  %s269_s1 = inlined_call_operand.hbm [shape: f32[8,256], index: 1, kind: input, shape index: {}]   ;;  %s270_s2 = inlined_call_operand.vmem [shape: f32[8,4], index: 2, kind: output, shape index: {}]  }
   0x1   :  { %8 = vsyncpa [#allocation5], 0  ;;  %s204_s9 = smov [#allocation2]   ;;  %s205_s11 = smov [#allocation4]  }
   0x2   :  { %s15_s10 = sshll.u32 %s204_s9, 4  ;;  %s25_s12 = sshll.u32 %s205_s11, 4  ;;  %s16_s10 = int_to_ptr.vmem [resolvable:$true] %s15_s10  ;;  %s26_s12 = int_to_ptr.vmem [resolvable:$true] %s25_s12 }
   0x3   :  { %s168_s13 = scalar_lea.vmem %s16_s10, 256  ;;  %p173_p1 = scmp.lt.s32.totalorder %s16_s10, %s16_s10 }
   0x4   :  { %p169_p0 = scmp.ne.s32.totalorder %s16_s10, %s168_s13  ;;  %p174_p2 = scmp.lt.s32.totalorder %s168_s13, %s168_s13 }
   0x6   :  { %p175_p3 = por %p174_p2, %p173_p1 }
   0x8   :  { %p176_p4 = pnand %p175_p3, %p169_p0 }
   0xa   :  { %179 = shalt.err (!%p176_p4)
}
   0xb   :  { %18 = dma.hbm_to_vmem [thread:$0]  %s268_s0, 256, %s16_s10, [#allocation3]  }
   0xc   :  { %s188_s16 = scalar_lea.vmem %s26_s12, 256  ;;  %p193_p6 = scmp.lt.s32.totalorder %s26_s12, %s26_s12 }
   0xd   :  { %p189_p5 = scmp.ne.s32.totalorder %s26_s12, %s188_s16  ;;  %p194_p7 = scmp.lt.s32.totalorder %s188_s16, %s188_s16 }
   0xf   :  { %p195_p8 = por %p194_p7, %p193_p6 }
  0x11   :  { %p196_p9 = pnand %p195_p8, %p189_p5 }
  0x13   :  { %199 = shalt.err (!%p196_p9)
}
  0x14   :  { %28 = dma.hbm_to_vmem [thread:$0]  %s269_s1, 256, %s26_s12, [#allocation5]  }
  0x15   :  { %200 = dma.done.wait [#allocation3], 256  }
  0x16   :  { %201 = vsyncadd [#allocation3], 4294967040 }
  0x17   :  { %202 = dma.done.wait [#allocation5], 256  }
  0x18   :  { %203 = vsyncadd [#allocation5], 4294967040  ;;  %vm39_vm0 = vcmask 31744   ;;  %v206_v0 = vmov 0.0   ;;  %v41_v1 = vld [vmem:[#allocation2] sm:$0xff]  ;;  %v42_v2 = vld [vmem:[#allocation2 + $0x8] sm:$0xff] }
  0x19   :  { %40 = vst.msk [vmem:[%s270_s2] sm:$0xff] %vm39_vm0, %v206_v0  ;;  %v231_v3 = vld [vmem:[#allocation4] sm:$0xff]  ;;  %v233_v4 = vld [vmem:[#allocation4 + $0x8] sm:$0xff]  ;;  %v45_v5 = vand.u32 2147483647, %v41_v1  ;;  %v71_v21 = vsub.f32 0.0, %v41_v1 }
  0x1a   :  { %v46_v6 = vand.u32 2147483647, %v42_v2  ;;  %v126_v7 = vadd.f32 %v233_v4, %v231_v3  ;;  %v72_v23 = vsub.f32 0.0, %v42_v2  ;;  %vm103_vm1 = vcmp.ge.f32.partialorder %v41_v1, 0.0 }
  0x1b   :  { %v47_v8 = vsub.f32 0.0, %v45_v5  ;;  %vm104_vm2 = vcmp.ge.f32.partialorder %v42_v2, 0.0  ;;  %v81_v28 = vmax.f32 %v41_v1, 0.0  ;;  %v82_v29 = vmax.f32 %v42_v2, 0.0 }
  0x1c   :  { %v48_v9 = vsub.f32 0.0, %v46_v6  ;;  %127 = vadd.xlane.f32.xlu1 %v126_v7  ;;  %v73_v33 = vmax.f32 %v71_v21, 0.0  ;;  %v74_v37 = vmax.f32 %v72_v23, 0.0  ;;  %v91_v51 = vsub.f32 1.0, %v231_v3 }
  0x1d   :  { %v49_v10 = vmul.f32 1.442695, %v47_v8  ;;  %v92_v55 = vsub.f32 1.0, %v233_v4  ;;  %vm116_vm5 = vcmask 7168   ;;  %vm123_vm6 = vcmask 15368  }
  0x1e   :  { %v51_v11 = vmul.f32 1.442695, %v48_v9  ;;  %vm130_vm7 = vcmask 23568   ;;  %vm137_vm8 = vcmask 31768  }
  0x1f   :  { %148 = vpow2.f32 %v49_v10 }
  0x20   :  { %150 = vpow2.f32 %v51_v11  ;;  %v109_v7 = vld [vmem:[%s270_s2] sm:$0xff] }
  0x2c   :  { %v149_v12 = vpop.eup %148 }
  0x2d   :  { %v151_v13 = vpop.eup %150  ;;  %v53_v14 = vadd.f32 1.0, %v149_v12  ;;  %v56_v16 = vmul.f32 -0.5, %v149_v12  ;;  %v59_v19 = vand.u32 2147483647, %v149_v12 }
  0x2e   :  { %v62_v15 = vadd.f32 1.0, %v151_v13  ;;  %v65_v17 = vmul.f32 -0.5, %v151_v13  ;;  %v68_v22 = vand.u32 2147483647, %v151_v13 }
  0x2f   :  { %152 = vrcp.f32 %v53_v14  ;;  %v57_v18 = vadd.f32 1.0, %v56_v16  ;;  %vm60_vm3 = vcmp.lt.f32.partialorder %v59_v19, 0.0004427343 }
  0x30   :  { %154 = vrcp.f32 %v62_v15  ;;  %v66_v20 = vadd.f32 1.0, %v65_v17  ;;  %vm69_vm4 = vcmp.lt.f32.partialorder %v68_v22, 0.0004427343 }
  0x31   :  { %156 = vlog2.f32 %v53_v14  ;;  %v58_v27 = vmul.f32 %v149_v12, %v57_v18 }
  0x32   :  { %158 = vlog2.f32 %v62_v15  ;;  %v67_v32 = vmul.f32 %v151_v13, %v66_v20 }
  0x3c   :  { %v153_v24 = vpop.eup %152 }
  0x3d   :  { %v155_v25 = vpop.eup %154  ;;  %v105_v26 = vmul.f32 %v153_v24, %v149_v12 }
  0x3e   :  { %v157_v30 = vpop.eup %156  ;;  %v106_v31 = vmul.f32 %v155_v25, %v151_v13 }
  0x3f   :  { %v159_v34 = vpop.eup %158  ;;  %v107_v35 = vsel %vm103_vm1, %v153_v24, %v105_v26  ;;  %v55_v36 = vmul.f32 0.6931472, %v157_v30 }
  0x40   :  { %v108_v38 = vsel %vm104_vm2, %v155_v25, %v106_v31  ;;  %v110_v39 = vmul.f32 %v107_v35, %v231_v3  ;;  %v64_v40 = vmul.f32 0.6931472, %v159_v34 }
  0x41   :  { %v111_v41 = vmul.f32 %v108_v38, %v233_v4  ;;  %v61_v42 = vsel %vm60_vm3, %v58_v27, %v55_v36  ;;  %v119_v52 = vadd.f32 %v108_v38, %v107_v35 }
  0x42   :  { %v70_v43 = vsel %vm69_vm4, %v67_v32, %v64_v40  ;;  %v75_v44 = vadd.f32 %v73_v33, %v61_v42  ;;  %v83_v45 = vadd.f32 %v81_v28, %v61_v42 }
  0x43   :  { %v112_v46 = vadd.f32 %v111_v41, %v110_v39  ;;  %v76_v47 = vadd.f32 %v74_v37, %v70_v43  ;;  %v84_v48 = vadd.f32 %v82_v29, %v70_v43 }
  0x44   :  { %v77_v49 = vsub.f32 0.0, %v75_v44  ;;  %v85_v50 = vsub.f32 0.0, %v83_v45 }
  0x45   :  { %113 = vadd.xlane.f32.xlu0 %v112_v46  ;;  %v78_v53 = vsub.f32 0.0, %v76_v47  ;;  %v86_v54 = vsub.f32 0.0, %v84_v48 }
  0x46   :  { %v79_v56 = vmax.f32 %v77_v49, -100.0  ;;  %v87_v57 = vmax.f32 %v85_v50, -100.0 }
  0x47   :  { %v80_v58 = vmax.f32 %v78_v53, -100.0  ;;  %v88_v59 = vmax.f32 %v86_v54, -100.0 }
  0x48   :  { %v89_v60 = vmul.f32 %v79_v56, %v231_v3  ;;  %v93_v61 = vmul.f32 %v91_v51, %v87_v57 }
  0x49   :  { %120 = vadd.xlane.f32.xlu0 %v119_v52  ;;  %v90_v62 = vmul.f32 %v80_v58, %v233_v4  ;;  %v94_v63 = vmul.f32 %v92_v55, %v88_v59 }
  0x4a   :  { %v95_v0 = vadd.f32 %v93_v61, %v89_v60 }
  0x4b   :  { %v96_v1 = vadd.f32 %v94_v63, %v90_v62 }
  0x4c   :  { %v97_v2 = vsub.f32 0.0, %v95_v0 }
  0x4d   :  { %v98_v5 = vsub.f32 0.0, %v96_v1 }
  0x4f   :  { %v133_v6 = vadd.f32 %v98_v5, %v97_v2 }
  0x51   :  { %134 = vadd.xlane.f32.xlu1 %v133_v6 }
  0xa5   :  { %v128_v11 = vpop.xlane.xlu1 %127 }
  0xce   :  { %v114_v8 = vpop.xlane.xlu0 %113 }
  0xcf   :  { %v115_v9 = vadd.f32 %v114_v8, %v109_v7 }
  0xd1   :  { %117 = vst.msk [vmem:[%s270_s2] sm:$0xff] %vm116_vm5, %v115_v9 }
  0xd2   :  { %v121_v3 = vpop.xlane.xlu0 %120 }
  0xd8   :  { %v118_v4 = vld [vmem:[%s270_s2] sm:$0xff] }
  0xd9   :  { %v122_v10 = vadd.f32 %v121_v3, %v118_v4 }
  0xda   :  { %v135_v14 = vpop.xlane.xlu1 %134 }
  0xdb   :  { %124 = vst.msk [vmem:[%s270_s2] sm:$0xff] %vm123_vm6, %v122_v10 }
  0xe2   :  { %v125_v12 = vld [vmem:[%s270_s2] sm:$0xff] }
  0xe3   :  { %v129_v13 = vadd.f32 %v128_v11, %v125_v12 }
  0xe5   :  { %131 = vst.msk [vmem:[%s270_s2] sm:$0xff] %vm130_vm7, %v129_v13 }
  0xec   :  { %v132_v15 = vld [vmem:[%s270_s2] sm:$0xff] }
  0xed   :  { %v136_v16 = vadd.f32 %v135_v14, %v132_v15 }
  0xef   :  { %138 = vst.msk [vmem:[%s270_s2] sm:$0xff] %vm137_vm8, %v136_v16 }
  0xf0   :  { %143 = vsyncpa [#allocation3], 1 }
  0xf1   :  { %144 = vsyncpa [#allocation5], 1 }

</bundles_post_ra>
